<compile_context>
chip_gen: v7x
topology: tpu7x:2x2x1
jax: 0.10.0
libtpu: 0.0.40
codegen_flags: <defaults>
</compile_context>

<pallas_src>
import functools

import jax
import jax.numpy as jnp
from jax.experimental import pallas as pl
from jax.experimental.pallas import tpu as pltpu


def _se_kernel(x_ref, w1t_ref, b1_ref, w2t_ref, b2_ref, o_ref, *, inv_t):
    # x_ref block: (TB, C, Tp); weights/biases are full, VMEM-resident blocks.
    x = x_ref[...].astype(jnp.float32)                          # (TB, C, Tp)

    # --- squeeze: global average pool over (real) time -------------------
    # Padded tail is zero, so sum over Tp * (1/T_real) == mean over T_real.
    s = jnp.sum(x, axis=-1) * inv_t                             # (TB, C)

    # --- excitation: two 1x1 convs == GEMMs on the MXU, f32 accumulate ---
    h = jnp.dot(s, w1t_ref[...],
                preferred_element_type=jnp.float32) + b1_ref[...]   # (TB, Bn)
    h = jnp.maximum(h, 0.0)
    a = jnp.dot(h, w2t_ref[...],
                preferred_element_type=jnp.float32) + b2_ref[...]   # (TB, C)
    a = jax.nn.sigmoid(a)

    # --- scale: broadcast gate over the (lane) time axis ------------------
    o_ref[...] = (x * a[:, :, None]).astype(o_ref.dtype)


def _pick_batch_tile(B, C, Tp, itemsize, budget_bytes):
    """Largest TB dividing B whose double-buffered in+out blocks fit budget."""
    per_b = C * Tp * itemsize
    max_tb = max(1, budget_bytes // (4 * per_b))   # (in + out) x double-buffer
    tb = min(B, int(max_tb))
    while B % tb != 0:
        tb -= 1
    # Prefer >= 2 grid steps so a second TensorCore (v7x) has work.
    if B // tb < 2 and tb > 1:
        tb2 = tb // 2
        while tb2 > 1 and B % tb2 != 0:
            tb2 -= 1
        tb = max(1, tb2)
    return tb


def se_module(x, w1, b1, w2, b2):
    """x: (B, C, T); w1: (Bn, C); b1: (Bn, 1); w2: (C, Bn); b2: (C, 1)."""
    B, C, T = x.shape
    Bn = w1.shape[0]

    # Lane-dense time axis: pad T up to a multiple of 128.
    Tp = ((T + 127) // 128) * 128
    x_in = x if Tp == T else jnp.pad(x, ((0, 0), (0, 0), (0, Tp - T)))

    tb = _pick_batch_tile(B, C, Tp, x.dtype.itemsize, budget_bytes=32 << 20)

    # Pre-transpose weights / lane-major biases: no in-kernel XLU permutes.
    w1t = jnp.asarray(w1).T                  # (C, Bn)
    w2t = jnp.asarray(w2).T                  # (Bn, C)
    b1r = jnp.asarray(b1).reshape(1, Bn)     # broadcast over TB rows (VPU)
    b2r = jnp.asarray(b2).reshape(1, C)

    kernel = functools.partial(_se_kernel, inv_t=1.0 / float(T))

    out = pl.pallas_call(
        kernel,
        out_shape=jax.ShapeDtypeStruct((B, C, Tp), x.dtype),
        grid_spec=pltpu.PrefetchScalarGridSpec(
            num_scalar_prefetch=0,
            grid=(B // tb,),
            in_specs=[
                pl.BlockSpec((tb, C, Tp), lambda b: (b, 0, 0)),   # x slab
                pl.BlockSpec((C, Bn), lambda b: (0, 0)),          # w1^T (resident)
                pl.BlockSpec((1, Bn), lambda b: (0, 0)),          # b1 (lane-major)
                pl.BlockSpec((Bn, C), lambda b: (0, 0)),          # w2^T (resident)
                pl.BlockSpec((1, C), lambda b: (0, 0)),           # b2 (lane-major)
            ],
            out_specs=pl.BlockSpec((tb, C, Tp), lambda b: (b, 0, 0)),
        ),
        compiler_params=pltpu.CompilerParams(
            dimension_semantics=("parallel",),
            vmem_limit_bytes=48 << 20,        # fits v7x (64 MiB) with headroom
        ),
    )(x_in, w1t, b1r, w2t, b2r)

    if Tp != T:
        out = out[:, :, :T]
    return out


def se_module_ref(x, w1, b1, w2, b2):
    """Pure-JAX reference of the PyTorch forward."""
    s = jnp.mean(x, axis=-1)                                # (B, C)
    h = jnp.maximum(s @ w1.T + b1[:, 0], 0.0)               # (B, Bn)
    a = jax.nn.sigmoid(h @ w2.T + b2[:, 0])                 # (B, C)
    return x * a[..., None]


if __name__ == "__main__":
    key = jax.random.PRNGKey(0)

    def run_case(B, C, T, Bn, key):
        kx, k1, k2, k3, k4 = jax.random.split(key, 5)
        x = jax.random.normal(kx, (B, C, T), dtype=jnp.float32)
        w1 = 0.1 * jax.random.normal(k1, (Bn, C), dtype=jnp.float32)
        b1 = 0.1 * jax.random.normal(k2, (Bn, 1), dtype=jnp.float32)
        w2 = 0.1 * jax.random.normal(k3, (C, Bn), dtype=jnp.float32)
        b2 = 0.1 * jax.random.normal(k4, (C, 1), dtype=jnp.float32)

        out = se_module(x, w1, b1, w2, b2)
        jax.block_until_ready(out)
        ref = se_module_ref(x, w1, b1, w2, b2)
        assert out.shape == (B, C, T)
        assert jnp.allclose(out, ref, atol=1e-5, rtol=1e-5), "mismatch vs reference"

    k0, k1 = jax.random.split(key)
    # Small case exercising the T-padding path (T=64 -> padded to 128).
    run_case(B=2, C=8, T=64, Bn=16, key=k0)
    # Lane-dense case with multiple batch-tiled grid steps.
    run_case(B=4, C=16, T=256, Bn=32, key=k1)

    print("KERNEL_OK")
</pallas_src>

<mosaic_0001>
module attributes {stable_mosaic.version = 11 : i64} {
  func.func @_se_kernel(%arg0: i32, %arg1: memref<1x8x128xf32, #tpu.memory_space<vmem>>, %arg2: memref<8x16xf32, #tpu.memory_space<vmem>>, %arg3: memref<1x16xf32, #tpu.memory_space<vmem>>, %arg4: memref<16x8xf32, #tpu.memory_space<vmem>>, %arg5: memref<1x8xf32, #tpu.memory_space<vmem>>, %arg6: memref<1x8x128xf32, #tpu.memory_space<vmem>>) attributes {dimension_semantics = [#tpu.dimension_semantics<parallel>], iteration_bounds = array<i64: 2>, scalar_prefetch = 0 : i64, scratch_operands = 0 : i64, tpu.core_type = #tpu.core_type<tc>, window_params = [{transform_indices = @transform_0, window_bounds = array<i64: 1, 8, 128>}, {pipeline_mode = #tpu.pipeline_mode<synchronous>, transform_indices = @transform_1, window_bounds = array<i64: 8, 16>}, {pipeline_mode = #tpu.pipeline_mode<synchronous>, transform_indices = @transform_2, window_bounds = array<i64: 1, 16>}, {pipeline_mode = #tpu.pipeline_mode<synchronous>, transform_indices = @transform_3, window_bounds = array<i64: 16, 8>}, {pipeline_mode = #tpu.pipeline_mode<synchronous>, transform_indices = @transform_4, window_bounds = array<i64: 1, 8>}, {transform_indices = @transform_5, window_bounds = array<i64: 1, 8, 128>}]} {
    %c0 = arith.constant 0 : index
    %c0_0 = arith.constant 0 : index
    %c0_1 = arith.constant 0 : index
    %0 = vector.load %arg1[%c0, %c0_0, %c0_1] : memref<1x8x128xf32, #tpu.memory_space<vmem>>, vector<1x8x128xf32>
    %cst = arith.constant dense<0.000000e+00> : vector<1x8xf32>
    %1 = vector.multi_reduction <add>, %0, %cst [2] : vector<1x8x128xf32> to vector<1x8xf32>
    %cst_2 = arith.constant 1.562500e-02 : f32
    %2 = vector.broadcast %cst_2 : f32 to vector<1x8xf32>
    %3 = arith.mulf %1, %2 : vector<1x8xf32>
    %c0_3 = arith.constant 0 : index
    %c0_4 = arith.constant 0 : index
    %4 = vector.load %arg2[%c0_3, %c0_4] : memref<8x16xf32, #tpu.memory_space<vmem>>, vector<8x16xf32>
    %cst_5 = arith.constant dense<0.000000e+00> : vector<1x16xf32>
    %5 = tpu.matmul %3, %4, %cst_5 {dimension_numbers = #tpu.dot_dimension_numbers<[1], [0], [0], [1], [0, 0, 1, 1], [], []>} : vector<1x8xf32>, vector<8x16xf32>, vector<1x16xf32> -> vector<1x16xf32>
    %c0_6 = arith.constant 0 : index
    %c0_7 = arith.constant 0 : index
    %6 = vector.load %arg3[%c0_6, %c0_7] : memref<1x16xf32, #tpu.memory_space<vmem>>, vector<1x16xf32>
    %7 = arith.addf %5, %6 : vector<1x16xf32>
    %cst_8 = arith.constant 0.000000e+00 : f32
    %8 = vector.broadcast %cst_8 : f32 to vector<1x16xf32>
    %9 = arith.maximumf %7, %8 : vector<1x16xf32>
    %c0_9 = arith.constant 0 : index
    %c0_10 = arith.constant 0 : index
    %10 = vector.load %arg4[%c0_9, %c0_10] : memref<16x8xf32, #tpu.memory_space<vmem>>, vector<16x8xf32>
    %cst_11 = arith.constant dense<0.000000e+00> : vector<1x8xf32>
    %11 = tpu.matmul %9, %10, %cst_11 {dimension_numbers = #tpu.dot_dimension_numbers<[1], [0], [0], [1], [0, 0, 1, 1], [], []>} : vector<1x16xf32>, vector<16x8xf32>, vector<1x8xf32> -> vector<1x8xf32>
    %c0_12 = arith.constant 0 : index
    %c0_13 = arith.constant 0 : index
    %12 = vector.load %arg5[%c0_12, %c0_13] : memref<1x8xf32, #tpu.memory_space<vmem>>, vector<1x8xf32>
    %13 = arith.addf %11, %12 : vector<1x8xf32>
    %14 = arith.negf %13 : vector<1x8xf32>
    %15 = math.exp %14 : vector<1x8xf32>
    %cst_14 = arith.constant 1.000000e+00 : f32
    %16 = vector.broadcast %cst_14 : f32 to vector<1x8xf32>
    %17 = arith.addf %16, %15 : vector<1x8xf32>
    %18 = arith.divf %16, %17 : vector<1x8xf32>
    %19 = vector.shape_cast %18 : vector<1x8xf32> to vector<1x8x1xf32>
    %20 = vector.broadcast %19 : vector<1x8x1xf32> to vector<1x8x128xf32>
    %21 = arith.mulf %0, %20 : vector<1x8x128xf32>
    %c0_15 = arith.constant 0 : index
    %c0_16 = arith.constant 0 : index
    %c0_17 = arith.constant 0 : index
    %22 = vector.load %arg6[%c0_15, %c0_16, %c0_17] : memref<1x8x128xf32, #tpu.memory_space<vmem>>, vector<1x8x128xf32>
    tpu.vector_store %arg6[%c0_15, %c0_16, %c0_17], %21 {strides = array<i32>} : memref<1x8x128xf32, #tpu.memory_space<vmem>>, vector<1x8x128xf32>,
    return
  }
  func.func @transform_0(%arg0: i32) -> (i32, i32, i32) {
    %c0_i32 = arith.constant 0 : i32
    %c0_i32_0 = arith.constant 0 : i32
    %c0_i32_1 = arith.constant 0 : i32
    return %arg0, %c0_i32, %c0_i32_0 : i32, i32, i32
  }
  func.func @transform_1(%arg0: i32) -> (i32, i32) {
    %c0_i32 = arith.constant 0 : i32
    %c0_i32_0 = arith.constant 0 : i32
    %c0_i32_1 = arith.constant 0 : i32
    return %c0_i32, %c0_i32_0 : i32, i32
  }
  func.func @transform_2(%arg0: i32) -> (i32, i32) {
    %c0_i32 = arith.constant 0 : i32
    %c0_i32_0 = arith.constant 0 : i32
    %c0_i32_1 = arith.constant 0 : i32
    return %c0_i32, %c0_i32_0 : i32, i32
  }
  func.func @transform_3(%arg0: i32) -> (i32, i32) {
    %c0_i32 = arith.constant 0 : i32
    %c0_i32_0 = arith.constant 0 : i32
    %c0_i32_1 = arith.constant 0 : i32
    return %c0_i32, %c0_i32_0 : i32, i32
  }
  func.func @transform_4(%arg0: i32) -> (i32, i32) {
    %c0_i32 = arith.constant 0 : i32
    %c0_i32_0 = arith.constant 0 : i32
    %c0_i32_1 = arith.constant 0 : i32
    return %c0_i32, %c0_i32_0 : i32, i32
  }
  func.func @transform_5(%arg0: i32) -> (i32, i32, i32) {
    %c0_i32 = arith.constant 0 : i32
    %c0_i32_0 = arith.constant 0 : i32
    %c0_i32_1 = arith.constant 0 : i32
    return %arg0, %c0_i32, %c0_i32_0 : i32, i32, i32
  }
}

</mosaic_0001>

<bundles_post_ra>
// kernel: tpu_custom_call.1
= control target key start
LH: loop header
LB: loop body
LE: loop exit
PB: predicated region body
PF: predicated region fallthrough
CT: control target
= control target key end

     0   :  { %10 = vsyncpa [#allocation3], 0  ;;  %s764_s0 = inlined_call_operand.vmem [shape: f32[2,8,128], index: 0, kind: input, shape index: {}]   ;;  %s765_s1 = inlined_call_operand.vmem [shape: f32[8,16], index: 1, kind: input, shape index: {}]   ;;  %s766_s2 = inlined_call_operand.vmem [shape: f32[1,16], index: 2, kind: input, shape index: {}]   ;;  %s767_s3 = inlined_call_operand.vmem [shape: f32[16,8], index: 3, kind: input, shape index: {}]   ;;  %s768_s4 = inlined_call_operand.vmem [shape: f32[1,8], index: 4, kind: input, shape index: {}]   ;;  %s769_s5 = inlined_call_operand.hbm [shape: f32[2,8,128], index: 5, kind: output, shape index: {}]  }
   0x1   :  { %12 = vsyncpa [#allocation3 + $0x1], 0  ;;  %s649_s18 = smov 0   ;;  %s651_s19 = smov 0  }
   0x2   :  { %s653_s20 = smov 0   ;;  %s655_s21 = smov 0  }
   0x3 LB: > { %s670_s22 = sadd.s32 4294967295, %s613_s21   ;;  %s472_s23 = sadd.s32 4294967294, %s613_s21   ;;  %s613_s21 = sphi %s655_s21, %s775_s21   ;;  %s609_s20 = sphi %s653_s20, %s774_s20   ;;  %s605_s19 = sphi %s651_s19, %s773_s19   ;;  %s601_s18 = sphi %s649_s18, %s772_s18  }
   0x4   : > { %s674_s24 = sadd.s32 1, %s613_s21   ;;  %s135_s25 = sadd.s32 1, %s609_s20 }
   0x5   : > { %s132_s26 = ssub.s32 %s613_s21, %s674_s24  ;;  %p145_p0 = scmp.ne.s32.totalorder %s609_s20, %s605_s19 }
   0x6   : > { %p133_p1 = scmp.eq.s32.totalorder %s132_s26, 0  ;;  %p146_p2 = scmp.eq.s32.totalorder %s670_s22, 1 }
   0x7   : > { %p151_p3 = scmp.ne.s32.totalorder %s605_s19, %s601_s18  ;;  %p152_p4 = scmp.eq.s32.totalorder %s472_s23, 1 }
   0x8   : > { %s685_s27 = scalar_select %p133_p1, %s609_s20, %s135_s25  }
   0x9   : > { %p687_p5 = por %p146_p2, %p145_p0  ;;  %p691_p6 = por %p152_p4, %p151_p3 }
   0xa   : > { %p475_p7 = scmp.ge.s32.totalorder %s613_s21, 1  ;;  %p189_p8 = scmp.lt.s32.totalorder %s613_s21, 3 }
   0xc   : > { %p190_p9 = pnand %p475_p7, %p189_p8 }
   0xd   : > { %p216_p10 = scmp.lt.s32.totalorder (!%p190_p9), %s670_s22, 1  ;;  %v615_v1 = vmov (!%p190_p9), 0.0   ;;  %v224_v2 = vld [vmem:[%s765_s1] sm:$0xff] (!%p190_p9)  ;;  %vm616_vm0 = vmmov (!%p190_p9), 0   ;;  %v227_v3 = vlaneseq (!%p190_p9)  ;;  %vm233_vm1 = vcmask (!%p190_p9), 64512   ;;  %v308_v11 = vld [vmem:[%s767_s3 + $0x8] sm:$0xff] (!%p190_p9) }
   0xe   : > { %193 = sbr.rel (%p190_p9) target bundleno = 761 (0x2f9), region = 40  ;;  %490 = vmatprep.subr.mxu0 (!%p190_p9), %v615_v1  ;;  %492 = vmatprep.mubr.msk.f32.mxu0 (!%p190_p9), %vm616_vm0, %v615_v1  ;;  %v307_v10 = vld [vmem:[%s767_s3] sm:$0xff] (!%p190_p9)  ;;  %v617_v13 = vmov (!%p190_p9), 0.0|0.0   ;;  %vm310_vm2 = vcmask (!%p190_p9), 130048   ;;  %s213_s26 = sand.u32 (!%p190_p9), 1, %s605_s19  }
   0xf   : > { %491 = vmatpush3.msra.mxu0 (!%p190_p9), %v224_v2  ;;  %499 = vmatprep.mubr.msk.f32.mxu1 (!%p190_p9), %vm616_vm0, %v615_v1  ;;  %v228_v4 = vand.u32 (!%p190_p9), 127, %v227_v3  ;;  %v230_v5 = vshrl.u32 (!%p190_p9), %v227_v3, 7  ;;  %v503_v12 = vpack.c.bf16 (!%p190_p9), %v308_v11, %v307_v10  ;;  %v225_v14 = vld [vmem:[%s766_s2] sm:$0x1] (!%p190_p9)  ;;  %s400_s12 = scalar_lea.sflag (!%p190_p9), [#allocation3], %s213_s26 }
  0x10   : > { %502 = vmatprep.subr.bf16.mxu1 (!%p190_p9), %v617_v13  ;;  %v309_v19 = vld [vmem:[%s768_s4] sm:$0x1] (!%p190_p9) }
  0x11   : > { %v231_v6 = vsub.s32 (!%p190_p9), %v228_v4, %v230_v5  ;;  %504 = vmatpush3.bf16.msra.mxu1 (!%p190_p9), %v503_v12  ;;  %v392_v26 = vsub.s32 (!%p190_p9), 0, %v230_v5 }
  0x15   : > { %s217_s30 = scalar_select %p216_p10, %s670_s22, 1 }
  0x17   : > { %s477_s6 = sshll.u32 %s217_s30, 3  ;;  %s476_s30 = sshll.u32 %s213_s26, 3 }
  0x18   : > { %s219_s9 = scalar_lea.vmem %s764_s0, %s477_s6  ;;  %s482_s6 = sshll.u32 %s670_s22, 7 }
  0x19   : > { %v220_v0 = vld [vmem:[%s219_s9] sm:$0xff]  ;;  %s215_s7 = scalar_lea.vmem [#allocation2], %s476_s30  ;;  %s722_s11 = scalar_lea.hbm %s769_s5, %s482_s6 }
  0x1a   : > { %221 = vadd.xlane.f32.xlu0 %v220_v0  ;;  %s413_s8 = sshll.u32 %s215_s7, 4  ;;  %s618_s22 = smov [#allocation2]   ;;  %s724_s8 = int_to_ptr.vmem [resolvable:$true] %s413_s8 }
  0x1b   : > { %s551_s13 = scalar_lea.vmem %s724_s8, 128  ;;  %s555_s14 = sshll.u32 %s618_s22, 4  ;;  %s556_s14 = int_to_ptr.vmem [resolvable:$false] %s555_s14 }
  0x1c   : > { %p552_p11 = scmp.ne.s32.totalorder %s724_s8, %s551_s13  ;;  %s557_s15 = scalar_lea.vmem %s556_s14, 256 }
  0x1d   : > { %p558_p0 = scmp.lt.s32.totalorder %s724_s8, %s556_s14  ;;  %p559_p1 = scmp.lt.s32.totalorder %s557_s15, %s551_s13 }
  0x1e   : > { %p553_p12 = pnand %p552_p11, %p687_p5 }
  0x1f   : > { %p560_p2 = por %p559_p1, %p558_p0 }
  0x20   : > { %p554_p13 = pneg %p553_p12 }
  0x22   : > { %p561_p3 = pnand %p560_p2, %p554_p13 }
  0xa7   : > { %v222_v7 = vpop.xlane.xlu0 %221 }
  0xa8   : > { %v223_v8 = vmul.f32 0.015625, %v222_v7 }
  0xaa   : > { %v232_v9 = vrot.slane %v223_v8, %v231_v6 }
  0xac   : > { %493 = vmatmul.mubr.msk.f32.vlgmr.msra.gmra.mrb[0].mxu0 %vm233_vm1, %v232_v9 }
 0x17f   : > { %v302_v15 = vpop.f32.mrb[0].mxu0 }
 0x180   : > { %v303_v16 = vadd.f32 %v302_v15, %v225_v14  ;;  %v494_v17 = vpop.f32.mrb[1].mxu0 }
 0x182   : > { %v306_v18 = vmax.f32 %v303_v16, 0.0 }
 0x184   : > { %500 = vmatmul.mubr.msk.f32.vlgmr.msra.gmra.mrb[0].mxu1 %vm310_vm2, %v306_v18 }
 0x257   : > { %v380_v20 = vpop.f32.mrb[0].mxu1 }
 0x258   : > { %v381_v21 = vadd.f32 %v380_v20, %v309_v19  ;;  %v501_v22 = vpop.f32.mrb[1].mxu1 }
 0x25a   : > { %v480_v23 = vmul.f32 -1.442695, %v381_v21 }
 0x25c   : > { %547 = vpow2.f32 %v480_v23 }
 0x266   : > { %v548_v24 = vpop.eup %547 }
 0x267   : > { %v387_v25 = vadd.f32 1.0, %v548_v24 }
 0x269   : > { %549 = vrcp.f32 %v387_v25 }
 0x273   : > { %v550_v27 = vpop.eup %549 }
 0x274   : > { %v393_v28 = vrot.slane %v550_v27, %v392_v26 }
 0x276   : > { %395 = vbcast.lane.b32.xlu0 %v393_v28, 256 }
 0x2e8   : > { %v396_v29 = vpop.permute.xlu0 %395 }
 0x2e9   : > { %v397_v30 = vmul.f32 %v396_v29, %v220_v0 }
 0x2eb   : > { %398 = vst [vmem:[%s215_s7] sm:$0xff] %v397_v30 }
 0x2ec   : > { %564 = shalt.err (!%p561_p3)
}
 0x2ed   : > { %s565_s16 = scalar_lea.hbm %s722_s11, 128  ;;  %s569_s25 = scalar_lea.hbm %s769_s5, 256 }
 0x2ee   : > { %p566_p4 = scmp.ne.s32.totalorder %s722_s11, %s565_s16  ;;  %p570_p9 = scmp.lt.u32.totalorder %s722_s11, %s769_s5 }
 0x2ef   : > { %p571_p10 = scmp.lt.u32.totalorder %s569_s25, %s565_s16  ;;  %p573_p12 = scmp.lt.u32.totalorder %s565_s16, %s722_s11 }
 0x2f0   : > { %p567_p7 = pnand %p566_p4, %p687_p5 }
 0x2f1   : > { %p572_p11 = por %p571_p10, %p570_p9 }
 0x2f2   : > { %p568_p8 = pneg %p567_p7 }
 0x2f3   : > { %p574_p13 = por %p573_p12, %p572_p11 }
 0x2f5   : > { %p575_p0 = pnand %p574_p13, %p568_p8 }
 0x2f7   : > { %578 = shalt.err (!%p575_p0)
}
 0x2f8   : > { %505 = dma.vmem_to_hbm [thread:$0]  (%p687_p5), %s724_s8, 128, %s722_s11, %s400_s12  }
 0x2f9 PF: > { %p511_p1 = scmp.ge.s32.totalorder %s613_s21, 2  ;;  %s425_s6 = sand.u32 1, %s601_s18  }
 0x2fa   : > { %s426_s7 = scalar_lea.sflag [#allocation3], %s425_s6 }
 0x2fb   : > { %p508_p2 = pnand %p511_p1, %p691_p6 }
 0x2fd   : > { %596 = dma.done.wait (!%p508_p2), %s426_s7, 128  }
 0x2fe   : > { %598 = vsyncadd (!%p508_p2), %s426_s7, 4294967168  ;;  %p15_p3 = scmp.ge.s32.totalorder %s674_s24, 4   ;;  %s772_s18 = smov %s605_s19 }
 0x2ff   : > { %s773_s19 = smov %s609_s20  ;;  %s774_s20 = smov %s685_s27 }
 0x300   : > { %s775_s21 = smov %s674_s24  ;;  %17 = sbr.rel (!%p15_p3) target bundleno = 3 (0x3), region = 75 }
 0x307   :  { %431 = vsyncpa [#allocation3], 1 }
 0x308   :  { %433 = vsyncpa [#allocation3 + $0x1], 1 }

</bundles_post_ra>
